<compile_context>
chip_gen: v5e
topology: v5e:2x2
jax: 0.10.0
libtpu: 0.0.40
codegen_flags: <defaults>
</compile_context>

<pallas_src>
import functools

import jax
import jax.numpy as jnp
from jax import lax
from jax.experimental import pallas as pl
from jax.experimental.pallas import tpu as pltpu


def _nll_kernel(pred_ref, tgt_ref, w_ref, num_out_ref, den_out_ref,
                num_acc, den_acc, *, C, rem_px, needs_mask):
    p = pl.program_id(1)
    i = pl.program_id(2)

    @pl.when(i == 0)
    def _():
        num_acc[...] = jnp.zeros_like(num_acc)
        den_acc[...] = jnp.zeros_like(den_acc)

    # Running argmax over channels, first index on ties (== torch/jnp.argmax):
    # channel 0 seeds, strictly-greater comparisons update. Label smoothing
    # t*(1-ls)+ls/C with 0 <= ls < 1 is a monotone affine map, so it cannot
    # change the argmax -> dropped from the kernel.
    best_t = tgt_ref[0].astype(jnp.float32)                    # (r_tile, 128)
    g = pred_ref[0].astype(jnp.float32)                        # pred at argmax
    sw = jnp.broadcast_to(w_ref[0].astype(jnp.float32), best_t.shape)
    for c in range(1, C):                                      # static unroll
        t_c = tgt_ref[c].astype(jnp.float32)
        upd = t_c > best_t
        best_t = jnp.where(upd, t_c, best_t)
        g = jnp.where(upd, pred_ref[c].astype(jnp.float32), g)
        sw = jnp.where(upd, w_ref[c].astype(jnp.float32), sw)

    def _accumulate(g_v, sw_v):
        num_acc[...] += sw_v * jax.nn.sigmoid(g_v)
        den_acc[...] += sw_v

    if needs_mask:
        # Only the globally-last pixel tile holds wrapper padding and/or
        # out-of-bounds (garbage) rows; every other step skips the mask work.
        is_last = jnp.logical_and(p == pl.num_programs(1) - 1,
                                  i == pl.num_programs(2) - 1)

        @pl.when(jnp.logical_not(is_last))
        def _():
            _accumulate(g, sw)

        @pl.when(is_last)
        def _():
            # Mask BOTH the weight and the sigmoid argument so garbage
            # (possibly NaN) padding never reaches the accumulators (0*NaN).
            r_idx = lax.broadcasted_iota(jnp.int32, best_t.shape, 0)
            l_idx = lax.broadcasted_iota(jnp.int32, best_t.shape, 1)
            valid = (r_idx * 128 + l_idx) < rem_px
            _accumulate(jnp.where(valid, g, 0.0), jnp.where(valid, sw, 0.0))
    else:
        _accumulate(g, sw)

    @pl.when(i == pl.num_programs(2) - 1)
    def _():
        num_out_ref[...] = jnp.broadcast_to(jnp.sum(num_acc[...]),
                                            num_out_ref.shape)
        den_out_ref[...] = jnp.broadcast_to(jnp.sum(den_acc[...]),
                                            den_out_ref.shape)


def _round_down(x, m):
    return (x // m) * m


def _round_up(x, m):
    return -(-x // m) * m


def _vmem_block_budget_bytes():
    """VMEM budget for pipelined blocks, generation-aware with a safe fallback."""
    cap = None
    try:
        cap = getattr(pltpu.get_tpu_info(), "vmem_capacity_bytes", None)
    except Exception:
        cap = None
    if not cap:
        cap = 64 << 20            # assume the smallest per-TC VMEM (v7x)
    return min(cap // 2, 24 << 20)


def nllloss_pallas(pred_nchw, target_nchw, w, *, label_smoothing=0.0,
                   vmem_block_budget=None):
    """Weighted NLL loss over sigmoid(pred) with argmax(target, dim=1) labels."""
    N, C, H, W = pred_nchw.shape
    assert target_nchw.shape == pred_nchw.shape
    assert w.shape == (C,), "Loss weights should be equal to the output channels."
    # argmax is invariant under the label-smoothing transform for ls in [0, 1)
    assert 0.0 <= float(label_smoothing) < 1.0

    HW = H * W
    HW_pad = _round_up(HW, 128)

    # (N, C, HW) views; pad pixel axis to a lane multiple only when needed
    # (segmentation maps with HW % 128 == 0 take the zero-copy path).
    pred3 = pred_nchw.reshape(N, C, HW)
    tgt3 = target_nchw.reshape(N, C, HW)
    if HW_pad != HW:
        pad = HW_pad - HW
        pred3 = jnp.pad(pred3, ((0, 0), (0, 0), (0, pad)))
        tgt3 = jnp.pad(tgt3, ((0, 0), (0, 0), (0, pad)))
    R = HW_pad // 128
    pred4 = pred3.reshape(N, C, R, 128)        # dense, fully-occupied vregs
    tgt4 = tgt3.reshape(N, C, R, 128)
    w2 = jnp.broadcast_to(w.astype(jnp.float32).reshape(C, 1), (C, 128))

    # --- pixel tile sizing: >= ~1 MiB per input block, capped by VMEM budget ---
    if vmem_block_budget is None:
        vmem_block_budget = _vmem_block_budget_bytes()
    per_px_bytes = 16 * C + 8      # 2 inputs x 2 bufs x C x f32 + 2 f32 accumulators
    tile_px = max(4096, _round_down((1 << 20) // (4 * C), 128))
    tile_px = min(tile_px,
                  max(128, _round_down(vmem_block_budget // per_px_bytes, 128)))
    tile_px = min(tile_px, HW_pad)

    r_tile = max(1, tile_px // 128)
    if r_tile >= R:
        r_tile = R                               # single tile: full array extent
    else:
        r_tile = max(8, _round_down(r_tile, 8))  # (8, 128)-aligned block rows
    tile_px = r_tile * 128
    n_tiles = -(-R // r_tile)
    needs_mask = (HW % tile_px) != 0
    rem_px = HW - (n_tiles - 1) * tile_px        # valid pixels in the last tile

    # Pixel-axis parallel split so v7x's 2nd TensorCore is used when the batch
    # axis alone cannot balance (N odd, notably N == 1). No-op on v5e/v6e.
    P = 2 if (N % 2 == 1 and n_tiles % 2 == 0) else 1
    T = n_tiles // P

    block_bytes = tile_px * per_px_bytes + 2 * C * 128 * 4
    vmem_limit = max(32 << 20, block_bytes + (8 << 20))

    kernel = functools.partial(_nll_kernel, C=C, rem_px=rem_px,
                               needs_mask=needs_mask)

    num_out, den_out = pl.pallas_call(
        kernel,
        out_shape=(jax.ShapeDtypeStruct((N, P, 128), jnp.float32),
                   jax.ShapeDtypeStruct((N, P, 128), jnp.float32)),
        grid_spec=pltpu.PrefetchScalarGridSpec(
            num_scalar_prefetch=0,
            grid=(N, P, T),
            in_specs=[
                pl.BlockSpec((pl.Squeezed(), C, r_tile, 128),
                             lambda n, p, i: (n, 0, p * T + i, 0)),
                pl.BlockSpec((pl.Squeezed(), C, r_tile, 128),
                             lambda n, p, i: (n, 0, p * T + i, 0)),
                pl.BlockSpec((C, 128), lambda n, p, i: (0, 0)),
            ],
            out_specs=[
                pl.BlockSpec((1, 1, 128), lambda n, p, i: (n, p, 0)),
                pl.BlockSpec((1, 1, 128), lambda n, p, i: (n, p, 0)),
            ],
            scratch_shapes=[
                pltpu.VMEM((r_tile, 128), jnp.float32),  # numerator partials
                pltpu.VMEM((r_tile, 128), jnp.float32),  # denominator partials
            ],
        ),
        compiler_params=pltpu.CompilerParams(
            dimension_semantics=("parallel", "parallel", "arbitrary"),
            vmem_limit_bytes=int(vmem_limit)),
    )(pred4, tgt4, w2)

    # final reduction + single divide in the wrapper (sum per-(n, p) partials)
    num = jnp.sum(num_out[:, :, 0])
    den = jnp.sum(den_out[:, :, 0])
    return -(num / den)


def _reference(pred, target, w, label_smoothing):
    C = pred.shape[1]
    tgt_s = target * (1.0 - label_smoothing) + label_smoothing / C
    idx = jnp.argmax(tgt_s, axis=1)                              # (N, H, W)
    p = jax.nn.sigmoid(pred)
    sel = jnp.take_along_axis(p, idx[:, None], axis=1)[:, 0]     # (N, H, W)
    wt = w[idx]
    return -jnp.sum(wt * sel) / jnp.sum(wt)


if __name__ == "__main__":
    # module params (deterministic, in-script): outchannels=4, per-class weights
    outchannels = 4
    label_smoothing = 0.1
    w = jnp.array([0.5, 1.0, 1.5, 2.0], dtype=jnp.float32)

    # inputs: NCHW, batch=2, channels=4, spatial=16x16
    key = jax.random.PRNGKey(0)
    k1, k2 = jax.random.split(key)
    pred = jax.random.normal(k1, (2, outchannels, 16, 16), dtype=jnp.float32)
    # target: soft one-hot-ish map (argmax over channels defines the label)
    target = jax.nn.softmax(
        jax.random.normal(k2, (2, outchannels, 16, 16), dtype=jnp.float32) * 3.0,
        axis=1)

    loss = nllloss_pallas(pred, target, w, label_smoothing=label_smoothing)
    loss = jax.block_until_ready(loss)

    ref = _reference(pred, target, w, label_smoothing)
    assert jnp.allclose(loss, ref, atol=1e-5, rtol=1e-5), (loss, ref)

    print("KERNEL_OK")
</pallas_src>

<mosaic_0001>
module attributes {stable_mosaic.version = 11 : i64} {
  func.func @_nll_kernel(%arg0: i32, %arg1: i32, %arg2: i32, %arg3: memref<1x4x2x128xf32, #tpu.memory_space<vmem>>, %arg4: memref<1x4x2x128xf32, #tpu.memory_space<vmem>>, %arg5: memref<4x128xf32, #tpu.memory_space<vmem>>, %arg6: memref<1x1x128xf32, #tpu.memory_space<vmem>>, %arg7: memref<1x1x128xf32, #tpu.memory_space<vmem>>, %arg8: memref<2x128xf32, #tpu.memory_space<vmem>>, %arg9: memref<2x128xf32, #tpu.memory_space<vmem>>) attributes {dimension_semantics = [#tpu.dimension_semantics<parallel>, #tpu.dimension_semantics<parallel>, #tpu.dimension_semantics<arbitrary>], iteration_bounds = array<i64: 2, 1, 1>, scalar_prefetch = 0 : i64, scratch_operands = 2 : i64, tpu.core_type = #tpu.core_type<tc>, window_params = [{transform_indices = @transform_0, window_bounds = array<i64: 1, 4, 2, 128>}, {transform_indices = @transform_1, window_bounds = array<i64: 1, 4, 2, 128>}, {pipeline_mode = #tpu.pipeline_mode<synchronous>, transform_indices = @transform_2, window_bounds = array<i64: 4, 128>}, {transform_indices = @transform_3, window_bounds = array<i64: 1, 1, 128>}, {transform_indices = @transform_4, window_bounds = array<i64: 1, 1, 128>}]} {
    %c0_i32 = arith.constant 0 : i32
    %0 = arith.cmpi eq, %arg2, %c0_i32 : i32
    %1 = arith.extui %0 : i1 to i32
    %c0_i32_0 = arith.constant 0 : i32
    %2 = arith.cmpi ne, %1, %c0_i32_0 : i32
    scf.if %2 {
      %cst_47 = arith.constant 0.000000e+00 : f32
      %61 = vector.broadcast %cst_47 : f32 to vector<2x128xf32>
      %c0_48 = arith.constant 0 : index
      %c0_49 = arith.constant 0 : index
      %62 = vector.load %arg8[%c0_48, %c0_49] : memref<2x128xf32, #tpu.memory_space<vmem>>, vector<2x128xf32>
      tpu.vector_store %arg8[%c0_48, %c0_49], %61 {strides = array<i32>} : memref<2x128xf32, #tpu.memory_space<vmem>>, vector<2x128xf32>,
      %cst_50 = arith.constant 0.000000e+00 : f32
      %63 = vector.broadcast %cst_50 : f32 to vector<2x128xf32>
      %c0_51 = arith.constant 0 : index
      %c0_52 = arith.constant 0 : index
      %64 = vector.load %arg9[%c0_51, %c0_52] : memref<2x128xf32, #tpu.memory_space<vmem>>, vector<2x128xf32>
      tpu.vector_store %arg9[%c0_51, %c0_52], %63 {strides = array<i32>} : memref<2x128xf32, #tpu.memory_space<vmem>>, vector<2x128xf32>,
    } else {
    }
    %c0 = arith.constant 0 : index
    %c0_1 = arith.constant 0 : index
    %c0_2 = arith.constant 0 : index
    %c0_3 = arith.constant 0 : index
    %3 = vector.load %arg4[%c0, %c0_1, %c0_2, %c0_3] : memref<1x4x2x128xf32, #tpu.memory_space<vmem>>, vector<1x1x2x128xf32>
    %4 = vector.shape_cast %3 : vector<1x1x2x128xf32> to vector<2x128xf32>
    %c0_4 = arith.constant 0 : index
    %c0_5 = arith.constant 0 : index
    %c0_6 = arith.constant 0 : index
    %c0_7 = arith.constant 0 : index
    %5 = vector.load %arg3[%c0_4, %c0_5, %c0_6, %c0_7] : memref<1x4x2x128xf32, #tpu.memory_space<vmem>>, vector<1x1x2x128xf32>
    %6 = vector.shape_cast %5 : vector<1x1x2x128xf32> to vector<2x128xf32>
    %c0_8 = arith.constant 0 : index
    %c0_9 = arith.constant 0 : index
    %7 = vector.load %arg5[%c0_8, %c0_9] : memref<4x128xf32, #tpu.memory_space<vmem>>, vector<1x128xf32>
    %8 = vector.shape_cast %7 : vector<1x128xf32> to vector<128xf32>
    %9 = vector.shape_cast %8 : vector<128xf32> to vector<1x128xf32>
    %10 = vector.broadcast %9 : vector<1x128xf32> to vector<2x128xf32>
    %c0_10 = arith.constant 0 : index
    %c1 = arith.constant 1 : index
    %c0_11 = arith.constant 0 : index
    %c0_12 = arith.constant 0 : index
    %11 = vector.load %arg4[%c0_10, %c1, %c0_11, %c0_12] : memref<1x4x2x128xf32, #tpu.memory_space<vmem>>, vector<1x1x2x128xf32>
    %12 = vector.shape_cast %11 : vector<1x1x2x128xf32> to vector<2x128xf32>
    %13 = arith.cmpf ogt, %12, %4 : vector<2x128xf32>
    %14 = arith.select %13, %12, %4 : vector<2x128xi1>, vector<2x128xf32>
    %c0_13 = arith.constant 0 : index
    %c1_14 = arith.constant 1 : index
    %c0_15 = arith.constant 0 : index
    %c0_16 = arith.constant 0 : index
    %15 = vector.load %arg3[%c0_13, %c1_14, %c0_15, %c0_16] : memref<1x4x2x128xf32, #tpu.memory_space<vmem>>, vector<1x1x2x128xf32>
    %16 = vector.shape_cast %15 : vector<1x1x2x128xf32> to vector<2x128xf32>
    %17 = arith.select %13, %16, %6 : vector<2x128xi1>, vector<2x128xf32>
    %c1_17 = arith.constant 1 : index
    %c0_18 = arith.constant 0 : index
    %18 = vector.load %arg5[%c1_17, %c0_18] : memref<4x128xf32, #tpu.memory_space<vmem>>, vector<1x128xf32>
    %19 = vector.shape_cast %18 : vector<1x128xf32> to vector<128xf32>
    %20 = vector.shape_cast %19 : vector<128xf32> to vector<1x128xf32>
    %21 = vector.broadcast %20 : vector<1x128xf32> to vector<2x128xf32>
    %22 = arith.select %13, %21, %10 : vector<2x128xi1>, vector<2x128xf32>
    %c0_19 = arith.constant 0 : index
    %c2 = arith.constant 2 : index
    %c0_20 = arith.constant 0 : index
    %c0_21 = arith.constant 0 : index
    %23 = vector.load %arg4[%c0_19, %c2, %c0_20, %c0_21] : memref<1x4x2x128xf32, #tpu.memory_space<vmem>>, vector<1x1x2x128xf32>
    %24 = vector.shape_cast %23 : vector<1x1x2x128xf32> to vector<2x128xf32>
    %25 = arith.cmpf ogt, %24, %14 : vector<2x128xf32>
    %26 = arith.select %25, %24, %14 : vector<2x128xi1>, vector<2x128xf32>
    %c0_22 = arith.constant 0 : index
    %c2_23 = arith.constant 2 : index
    %c0_24 = arith.constant 0 : index
    %c0_25 = arith.constant 0 : index
    %27 = vector.load %arg3[%c0_22, %c2_23, %c0_24, %c0_25] : memref<1x4x2x128xf32, #tpu.memory_space<vmem>>, vector<1x1x2x128xf32>
    %28 = vector.shape_cast %27 : vector<1x1x2x128xf32> to vector<2x128xf32>
    %29 = arith.select %25, %28, %17 : vector<2x128xi1>, vector<2x128xf32>
    %c2_26 = arith.constant 2 : index
    %c0_27 = arith.constant 0 : index
    %30 = vector.load %arg5[%c2_26, %c0_27] : memref<4x128xf32, #tpu.memory_space<vmem>>, vector<1x128xf32>
    %31 = vector.shape_cast %30 : vector<1x128xf32> to vector<128xf32>
    %32 = vector.shape_cast %31 : vector<128xf32> to vector<1x128xf32>
    %33 = vector.broadcast %32 : vector<1x128xf32> to vector<2x128xf32>
    %34 = arith.select %25, %33, %22 : vector<2x128xi1>, vector<2x128xf32>
    %c0_28 = arith.constant 0 : index
    %c3 = arith.constant 3 : index
    %c0_29 = arith.constant 0 : index
    %c0_30 = arith.constant 0 : index
    %35 = vector.load %arg4[%c0_28, %c3, %c0_29, %c0_30] : memref<1x4x2x128xf32, #tpu.memory_space<vmem>>, vector<1x1x2x128xf32>
    %36 = vector.shape_cast %35 : vector<1x1x2x128xf32> to vector<2x128xf32>
    %37 = arith.cmpf ogt, %36, %26 : vector<2x128xf32>
    %c0_31 = arith.constant 0 : index
    %c3_32 = arith.constant 3 : index
    %c0_33 = arith.constant 0 : index
    %c0_34 = arith.constant 0 : index
    %38 = vector.load %arg3[%c0_31, %c3_32, %c0_33, %c0_34] : memref<1x4x2x128xf32, #tpu.memory_space<vmem>>, vector<1x1x2x128xf32>
    %39 = vector.shape_cast %38 : vector<1x1x2x128xf32> to vector<2x128xf32>
    %40 = arith.select %37, %39, %29 : vector<2x128xi1>, vector<2x128xf32>
    %c3_35 = arith.constant 3 : index
    %c0_36 = arith.constant 0 : index
    %41 = vector.load %arg5[%c3_35, %c0_36] : memref<4x128xf32, #tpu.memory_space<vmem>>, vector<1x128xf32>
    %42 = vector.shape_cast %41 : vector<1x128xf32> to vector<128xf32>
    %43 = vector.shape_cast %42 : vector<128xf32> to vector<1x128xf32>
    %44 = vector.broadcast %43 : vector<1x128xf32> to vector<2x128xf32>
    %45 = arith.select %37, %44, %34 : vector<2x128xi1>, vector<2x128xf32>
    %c0_37 = arith.constant 0 : index
    %c0_38 = arith.constant 0 : index
    %46 = vector.load %arg8[%c0_37, %c0_38] : memref<2x128xf32, #tpu.memory_space<vmem>>, vector<2x128xf32>
    %47 = arith.negf %40 : vector<2x128xf32>
    %48 = math.exp %47 : vector<2x128xf32>
    %cst = arith.constant 1.000000e+00 : f32
    %49 = vector.broadcast %cst : f32 to vector<2x128xf32>
    %50 = arith.addf %49, %48 : vector<2x128xf32>
    %51 = arith.divf %49, %50 : vector<2x128xf32>
    %52 = arith.mulf %45, %51 : vector<2x128xf32>
    %53 = arith.addf %46, %52 : vector<2x128xf32>
    %c0_39 = arith.constant 0 : index
    %c0_40 = arith.constant 0 : index
    %54 = vector.load %arg8[%c0_39, %c0_40] : memref<2x128xf32, #tpu.memory_space<vmem>>, vector<2x128xf32>
    tpu.vector_store %arg8[%c0_39, %c0_40], %53 {strides = array<i32>} : memref<2x128xf32, #tpu.memory_space<vmem>>, vector<2x128xf32>,
    %c0_41 = arith.constant 0 : index
    %c0_42 = arith.constant 0 : index
    %55 = vector.load %arg9[%c0_41, %c0_42] : memref<2x128xf32, #tpu.memory_space<vmem>>, vector<2x128xf32>
    %56 = arith.addf %55, %45 : vector<2x128xf32>
    %c0_43 = arith.constant 0 : index
    %c0_44 = arith.constant 0 : index
    %57 = vector.load %arg9[%c0_43, %c0_44] : memref<2x128xf32, #tpu.memory_space<vmem>>, vector<2x128xf32>
    tpu.vector_store %arg9[%c0_43, %c0_44], %56 {strides = array<i32>} : memref<2x128xf32, #tpu.memory_space<vmem>>, vector<2x128xf32>,
    %c0_i32_45 = arith.constant 0 : i32
    %58 = arith.cmpi eq, %arg2, %c0_i32_45 : i32
    %59 = arith.extui %58 : i1 to i32
    %c0_i32_46 = arith.constant 0 : i32
    %60 = arith.cmpi ne, %59, %c0_i32_46 : i32
    scf.if %60 {
      %c0_47 = arith.constant 0 : index
      %c0_48 = arith.constant 0 : index
      %61 = vector.load %arg8[%c0_47, %c0_48] : memref<2x128xf32, #tpu.memory_space<vmem>>, vector<2x128xf32>
      %62 = vector.shape_cast %61 : vector<2x128xf32> to vector<1x2x128xf32>
      %cst_49 = arith.constant dense<0.000000e+00> : vector<1xf32>
      %63 = vector.multi_reduction <add>, %62, %cst_49 [1, 2] : vector<1x2x128xf32> to vector<1xf32>
      %64 = vector.shape_cast %63 : vector<1xf32> to vector<1x1x1xf32>
      %65 = vector.extract %64[0, 0, 0] : f32 from vector<1x1x1xf32>
      %66 = vector.broadcast %65 : f32 to vector<1x1x128xf32>
      %c0_50 = arith.constant 0 : index
      %c0_51 = arith.constant 0 : index
      %c0_52 = arith.constant 0 : index
      %67 = vector.load %arg6[%c0_50, %c0_51, %c0_52] : memref<1x1x128xf32, #tpu.memory_space<vmem>>, vector<1x1x128xf32>
      tpu.vector_store %arg6[%c0_50, %c0_51, %c0_52], %66 {strides = array<i32>} : memref<1x1x128xf32, #tpu.memory_space<vmem>>, vector<1x1x128xf32>,
      %c0_53 = arith.constant 0 : index
      %c0_54 = arith.constant 0 : index
      %68 = vector.load %arg9[%c0_53, %c0_54] : memref<2x128xf32, #tpu.memory_space<vmem>>, vector<2x128xf32>
      %69 = vector.shape_cast %68 : vector<2x128xf32> to vector<1x2x128xf32>
      %cst_55 = arith.constant dense<0.000000e+00> : vector<1xf32>
      %70 = vector.multi_reduction <add>, %69, %cst_55 [1, 2] : vector<1x2x128xf32> to vector<1xf32>
      %71 = vector.shape_cast %70 : vector<1xf32> to vector<1x1x1xf32>
      %72 = vector.extract %71[0, 0, 0] : f32 from vector<1x1x1xf32>
      %73 = vector.broadcast %72 : f32 to vector<1x1x128xf32>
      %c0_56 = arith.constant 0 : index
      %c0_57 = arith.constant 0 : index
      %c0_58 = arith.constant 0 : index
      %74 = vector.load %arg7[%c0_56, %c0_57, %c0_58] : memref<1x1x128xf32, #tpu.memory_space<vmem>>, vector<1x1x128xf32>
      tpu.vector_store %arg7[%c0_56, %c0_57, %c0_58], %73 {strides = array<i32>} : memref<1x1x128xf32, #tpu.memory_space<vmem>>, vector<1x1x128xf32>,
    } else {
    }
    return
  }
  func.func @transform_0(%arg0: i32, %arg1: i32, %arg2: i32) -> (i32, i32, i32, i32) {
    %c1_i32 = arith.constant 1 : i32
    %0 = arith.muli %arg1, %c1_i32 : i32
    %1 = arith.addi %0, %arg2 : i32
    %c0_i32 = arith.constant 0 : i32
    %c0_i32_0 = arith.constant 0 : i32
    %c0_i32_1 = arith.constant 0 : i32
    return %arg0, %c0_i32, %1, %c0_i32_0 : i32, i32, i32, i32
  }
  func.func @transform_1(%arg0: i32, %arg1: i32, %arg2: i32) -> (i32, i32, i32, i32) {
    %c1_i32 = arith.constant 1 : i32
    %0 = arith.muli %arg1, %c1_i32 : i32
    %1 = arith.addi %0, %arg2 : i32
    %c0_i32 = arith.constant 0 : i32
    %c0_i32_0 = arith.constant 0 : i32
    %c0_i32_1 = arith.constant 0 : i32
    return %arg0, %c0_i32, %1, %c0_i32_0 : i32, i32, i32, i32
  }
  func.func @transform_2(%arg0: i32, %arg1: i32, %arg2: i32) -> (i32, i32) {
    %c0_i32 = arith.constant 0 : i32
    %c0_i32_0 = arith.constant 0 : i32
    %c0_i32_1 = arith.constant 0 : i32
    return %c0_i32, %c0_i32_0 : i32, i32
  }
  func.func @transform_3(%arg0: i32, %arg1: i32, %arg2: i32) -> (i32, i32, i32) {
    %c0_i32 = arith.constant 0 : i32
    %c0_i32_0 = arith.constant 0 : i32
    return %arg0, %arg1, %c0_i32 : i32, i32, i32
  }
  func.func @transform_4(%arg0: i32, %arg1: i32, %arg2: i32) -> (i32, i32, i32) {
    %c0_i32 = arith.constant 0 : i32
    %c0_i32_0 = arith.constant 0 : i32
    return %arg0, %arg1, %c0_i32 : i32, i32, i32
  }
}

</mosaic_0001>

<bundles_post_ra>
// kernel: tpu_custom_call.1
= control target key start
LH: loop header
LB: loop body
LE: loop exit
PB: predicated region body
PF: predicated region fallthrough
CT: control target
= control target key end

     0   :  { %s1138_s0 = inlined_call_operand.hbm [shape: f32[2,4,2,128], index: 0, kind: input, shape index: {}]   ;;  %s1139_s1 = inlined_call_operand.hbm [shape: f32[2,4,2,128], index: 1, kind: input, shape index: {}]   ;;  %s1140_s2 = inlined_call_operand.hbm [shape: f32[4,128], index: 2, kind: input, shape index: {}]   ;;  %s1141_s3 = inlined_call_operand.hbm [shape: f32[2,1,128], index: 3, kind: output, shape index: {0}]   ;;  %s1142_s4 = inlined_call_operand.hbm [shape: f32[2,1,128], index: 4, kind: output, shape index: {1}]  }
   0x1   :  { %1146 = sst [smem:[#allocation21_spill]] %s1138_s0 }
   0x2   :  { %1147 = sst [smem:[#allocation22_spill]] %s1140_s2 }
   0x3   :  { %10 = vsyncpa [#allocation5], 0 }
   0x4   :  { %12 = vsyncpa [#allocation5 + $0x1], 0 }
   0x5   :  { %13 = vsyncpa [#allocation8], 0 }
   0x6   :  { %15 = vsyncpa [#allocation8 + $0x1], 0 }
   0x7   :  { %16 = vsyncpa [#allocation6], 0 }
   0x8   :  { %18 = vsyncpa [#allocation6 + $0x1], 0 }
   0x9   :  { %19 = vsyncpa [#allocation12], 0 }
   0xa   :  { %21 = vsyncpa [#allocation12 + $0x1], 0  ;;  %s959_s15 = smov 0   ;;  %s961_s16 = smov 0  }
   0xb   :  { %s963_s17 = smov 0   ;;  %s965_s18 = smov 0  }
   0xc   :  { %s967_s19 = smov 0   ;;  %s969_s20 = smov 0  }
   0xd LB: > { %1148 = sst [smem:[#allocation18_spill]] %s924_s19  ;;  %s990_s21 = sadd.s32 4294967295, %s928_s20   ;;  %s928_s20 = sphi %s969_s20, %s27_s20   ;;  %s924_s19 = sphi %s967_s19, %s1161_s19   ;;  %s920_s18 = sphi %s965_s18, %s1160_s18   ;;  %s916_s17 = sphi %s963_s17, %s1164_s17   ;;  %s912_s16 = sphi %s961_s16, %s1163_s16   ;;  %s908_s15 = sphi %s959_s15, %s1162_s15  }
   0xe   : > { %s593_s22 = sadd.s32 4294967294, %s928_s20   ;;  %s57_s23 = sadd.s32 1, %s916_s17 }
   0xf   : > { %p64_p0 = scmp.ne.s32.totalorder %s916_s17, %s912_s16  ;;  %p65_p1 = scmp.eq.s32.totalorder %s928_s20, 0 }
  0x10   : > { %p70_p2 = scmp.ne.s32.totalorder %s912_s16, %s908_s15  ;;  %p71_p3 = scmp.eq.s32.totalorder %s990_s21, 0 }
  0x11   : > { %p147_p4 = scmp.eq.s32.totalorder %s990_s21, 1  ;;  %p1001_p5 = por %p65_p1, %p64_p0 }
  0x12   : > { %p153_p6 = scmp.eq.s32.totalorder %s593_s22, 1  ;;  %p1007_p7 = por %p71_p3, %p70_p2 }
  0x13   : > { %p1011_p8 = por %p147_p4, %p64_p0  ;;  %p594_p10 = scmp.ge.s32.totalorder %s928_s20, 1 }
  0x14   : > { %p1015_p9 = por %p153_p6, %p70_p2  ;;  %p188_p11 = scmp.lt.s32.totalorder %s928_s20, 3 }
  0x15   : > { %s1154_s2 = sld [smem:[#allocation22_spill]]  ;;  %s930_s6 = smov [#allocation9]  }
  0x16   : > { %s1152_s27 = scalar_select %p1015_p9, 1, 0 }
  0x17   : > { %p1024_p12 = pnand %p594_p10, %p188_p11  ;;  %s202_s7 = sshll.u32 %s930_s6, 4  ;;  %s203_s7 = int_to_ptr.vmem [resolvable:$true] %s202_s7 }
  0x18   : > { %1153 = sst [smem:[#allocation19_spill]] %s1152_s27  ;;  %p596_p13 = scmp.ge.s32.totalorder %s928_s20, 2 }
  0x19   : > { %p634_p0 = pneg %p1024_p12  ;;  %p653_p1 = scmp.lt.s32.totalorder %s928_s20, 2 }
  0x1a   : > { %s46_s9 = sadd.s32 1, %s924_s19  ;;  %s213_s10 = sand.u32 1, %s916_s17  }
  0x1b   : > { %s200_s30 = sshll.u32 %s1154_s2, 4  ;;  %p635_p2 = pnand %p634_p0, %p71_p3  ;;  %s201_s30 = int_to_ptr.hbm [resolvable:$true] %s200_s30 }
  0x1c   : > { %p1036_p4 = pnand %p653_p1, %p1001_p5  ;;  %p48_p6 = scmp.ge.s32.totalorder %s46_s9, 2 }
  0x1d   : > { %637 = dma.hbm_to_vmem [thread:$0]  (!%p635_p2), %s201_s30, 64, %s203_s7, [#allocation8]  }
  0x1e   : > { %s1166_s9 = smov (%p48_p6, %s46_s9), 0  ;;  %s597_s11 = sshll.u32 %s213_s10, 3 }
  0x1f   : > { %1157 = sst [smem:[#allocation20_spill]] %s1166_s9  ;;  %s52_s12 = ssub.s32 %s924_s19, %s1166_s9 }
  0x20   : > { %p55_p10 = scmp.eq.s32.totalorder %s52_s12, 0  ;;  %s616_s13 = sshll.u32 %s924_s19, 3 }
  0x21   : > { %s1158_s0 = sld [smem:[#allocation21_spill]]  ;;  %s217_s28 = scalar_lea.vmem [#allocation4], %s597_s11 }
  0x22   : > { %s227_s29 = sshll.u32 %s217_s28, 4  ;;  %s214_s7 = scalar_lea.sflag [#allocation5], %s213_s10  ;;  %s228_s29 = int_to_ptr.vmem [resolvable:$true] %s227_s29 }
  0x23   : > { %s1053_s6 = scalar_select %p55_p10, %s916_s17, %s57_s23  }
  0x24   : > { %s931_s2 = smov 32   ;;  %s932_s27 = smov 2  }
  0x25   : > { %s248_s14 = scalar_lea.hbm %s1139_s1, %s616_s13  ;;  %s241_s22 = scalar_lea.vmem [#allocation7], %s597_s11 }
  0x26   : > { %s249_s19 = sshll.u32 %s248_s14, 4  ;;  %s237_s23 = sand.u32 1, %s928_s20   ;;  %s250_s19 = int_to_ptr.hbm [resolvable:$true] %s249_s19 }
  0x27   : > { %s224_s24 = scalar_lea.hbm %s1158_s0, %s616_s13  ;;  %s251_s0 = sshll.u32 %s241_s22, 4  ;;  %s252_s0 = int_to_ptr.vmem [resolvable:$true] %s251_s0 }
  0x28   : > { %s225_s30 = sshll.u32 %s224_s24, 4  ;;  %s238_s28 = scalar_lea.sflag [#allocation8], %s237_s23  ;;  %s226_s30 = int_to_ptr.hbm [resolvable:$true] %s225_s30 }
  0x29   : > { %641 = dma.hbm_to_vmem [thread:$0]  (!%p1036_p4), %s226_s30, 128, %s228_s29, %s214_s7, %s931_s2, %s931_s2, %s932_s27  }
  0x2a   : > { %644 = dma.hbm_to_vmem [thread:$0]  (!%p1036_p4), %s250_s19, 128, %s252_s0, %s238_s28, %s931_s2, %s931_s2, %s932_s27  }
  0x2b   : > { %263 = sbr.rel (%p1024_p12) target bundleno = 299 (0x12b), region = 32  ;;  %s1066_s10 = sand.u32 (!%p1024_p12), 1, %s912_s16  }
  0x2c   : > { %s604_s9 = sshll.u32 (!%p1024_p12), %s1066_s10, 3  ;;  %s266_s13 = scalar_lea.sflag (!%p1024_p12), [#allocation5], %s1066_s10 }
  0x2d   : > { %s269_s11 = scalar_lea.vmem (!%p1024_p12), [#allocation4], %s604_s9 }
  0x30   : > { %887 = dma.done.wait (%p1007_p7), %s266_s13, 128  }
  0x31   : > { %889 = vsyncadd (%p1007_p7), %s266_s13, 4294967168  ;;  %s275_s0 = sand.u32 1, %s990_s21   ;;  %s279_s19 = scalar_lea.vmem [#allocation7], %s604_s9 }
  0x32   : > { %s276_s2 = scalar_lea.sflag [#allocation8], %s275_s0 }
  0x33   : > { %891 = dma.done.wait (%p1007_p7), %s276_s2, 128  }
  0x34   : > { %893 = vsyncadd (%p1007_p7), %s276_s2, 4294967168 }
  0x35   : > { %895 = dma.done.wait (%p71_p3), [#allocation8], 64  }
  0x36   : > { %897 = vsyncadd (%p71_p3), [#allocation8], 4294967232  ;;  %v933_v0 = vmov 0.0   ;;  %v326_v1 = vld [vmem:[%s279_s19] sm:$0x3]  ;;  %vm389_vm7 = vcmask 1041408   ;;  %s429_s27 = scalar_lea.hbm %s1141_s3, %s920_s18  ;;  %s443_s12 = scalar_lea.hbm %s1142_s4, %s920_s18 }
  0x37   : > { %324 = vst [vmem:[#allocation2] sm:$0x3] %v933_v0  ;;  %v327_v2 = vld [vmem:[%s269_s11] sm:$0x3]  ;;  %v607_v3 = vld [vmem:[%s279_s19 + $0x2] sm:$0x3] }
  0x38   : > { %325 = vst [vmem:[#allocation3] sm:$0x3] %v933_v0  ;;  %v608_v4 = vld [vmem:[%s269_s11 + $0x2] sm:$0x3]  ;;  %v708_v5 = vld [vmem:[#allocation9] ss:$0 sm:$0xff]  ;;  %vm332_vm0 = vcmp.gt.f32.partialorder %v607_v3, %v326_v1 }
  0x39   : > { %v609_v6 = vld [vmem:[%s279_s19 + $0x4] sm:$0x3]  ;;  %v333_v7 = vsel %vm332_vm0, %v607_v3, %v326_v1  ;;  %v336_v8 = vsel %vm332_vm0, %v608_v4, %v327_v2  ;;  %v709_v9 = vld [vmem:[#allocation9 + $0x1] ss:$0 sm:$0xff]  ;;  %v610_v10 = vld [vmem:[%s269_s11 + $0x4] sm:$0x3] }
  0x3a   : > { %vm342_vm1 = vcmp.gt.f32.partialorder %v609_v6, %v333_v7  ;;  %v611_v11 = vld [vmem:[%s279_s19 + $0x6] sm:$0x3]  ;;  %v612_v12 = vld [vmem:[%s269_s11 + $0x6] sm:$0x3]  ;;  %v710_v15 = vld [vmem:[#allocation9 + $0x2] ss:$0 sm:$0xff]  ;;  %v339_v16 = vsel %vm332_vm0, %v709_v9, %v708_v5 }
  0x3b   : > { %v343_v13 = vsel %vm342_vm1, %v609_v6, %v333_v7  ;;  %v346_v14 = vsel %vm342_vm1, %v610_v10, %v336_v8  ;;  %v711_v19 = vld [vmem:[#allocation9 + $0x3] ss:$0 sm:$0xff]  ;;  %v349_v20 = vsel %vm342_vm1, %v710_v15, %v339_v16  ;;  %s311_s5 = scalar_lea.vmem [#allocation10], %s1066_s10  ;;  %s433_s24 = sshll.u32 %s429_s27, 4  ;;  %s434_s24 = int_to_ptr.hbm [resolvable:$true] %s433_s24 }
  0x3c   : > { %vm352_vm2 = vcmp.gt.f32.partialorder %v611_v11, %v343_v13  ;;  %s431_s8 = sshll.u32 %s311_s5, 4  ;;  %s416_s14 = scalar_lea.sflag [#allocation6], %s1066_s10  ;;  %s432_s8 = int_to_ptr.vmem [resolvable:$true] %s431_s8 }
  0x3d   : > { %v355_v17 = vsel %vm352_vm2, %v612_v12, %v346_v14  ;;  %v358_v21 = vsel %vm352_vm2, %v711_v19, %v349_v20  ;;  %s820_s22 = sshra.s32 %s434_s24, 4  ;;  %s826_s13 = scalar_lea.hbm %s1141_s3, 2  ;;  %s821_s22 = int_to_ptr.hbm [resolvable:$true] %s820_s22 }
  0x3e   : > { %v613_v18 = vmul.f32 -1.442695, %v355_v17  ;;  %v359_v35 = vld [vmem:[#allocation2] sm:$0x3]  ;;  %s822_s23 = scalar_lea.hbm %s821_s22, 1  ;;  %p827_p11 = scmp.lt.s32.totalorder %s821_s22, %s1141_s3 }
  0x3f   : > { %v382_v22 = vld [vmem:[#allocation3] sm:$0x3]  ;;  %p823_p3 = scmp.ne.s32.totalorder %s821_s22, %s822_s23  ;;  %p828_p12 = scmp.lt.s32.totalorder %s826_s13, %s822_s23 }
  0x40   : > { %712 = vpow2.f32 %v613_v18  ;;  %v383_v23 = vadd.f32 %v382_v22, %v358_v21 }
  0x41   : > { %p824_p5 = pnand %p823_p3, %p1011_p8  ;;  %p829_p0 = por %p828_p12, %p827_p11 }
  0x42   : > { %384 = vst [vmem:[#allocation3] sm:$0x3] %v383_v23 }
  0x43   : > { %p825_p7 = pneg %p824_p5 }
  0x45   : > { %p830_p1 = pnand %p829_p0, %p825_p7 }
  0x46   : > { %v713_v24 = vpop.eup %712 }
  0x47   : > { %v363_v25 = vadd.f32 1.0, %v713_v24 }
  0x49   : > { %714 = vrcp.f32 %v363_v25  ;;  %v375_v28 = vand.u32 2147483648, %v363_v25  ;;  %vm369_vm3 = vweird.f32 %v363_v25  ;;  %v373_v30 = vand.u32 2147483647, %v363_v25  ;;  %v402_v41 = vld [vmem:[#allocation3] sm:$0x3] }
  0x4a   : > { %v403_v42 = vsel %vm389_vm7, %v402_v41, 0.0 }
  0x4b   : > { %v376_v32 = vor.u32 1.1754944e-38, %v375_v28  ;;  %vm374_vm6 = vcmp.eq.f32.partialorder %v373_v30, 8.507059e+37 }
  0x4f   : > { %v715_v26 = vpop.eup %714 }
  0x50   : > { %v365_v27 = vmul.f32 %v715_v26, %v363_v25  ;;  %vm370_vm4 = vweird.f32 %v715_v26 }
  0x51   : > { %vm371_vm5 = vmor %vm369_vm3, %vm370_vm4 }
  0x52   : > { %v366_v29 = vsub.f32 1.0, %v365_v27 }
  0x54   : > { %v367_v31 = vmul.f32 %v715_v26, %v366_v29 }
  0x56   : > { %v368_v33 = vadd.f32 %v715_v26, %v367_v31 }
  0x58   : > { %v372_v34 = vsel %vm371_vm5, %v715_v26, %v368_v33 }
  0x59   : > { %v377_v36 = vsel %vm374_vm6, %v376_v32, %v372_v34 }
  0x5a   : > { %v379_v37 = vmul.f32 %v377_v36, %v358_v21 }
  0x5c   : > { %v380_v38 = vadd.f32 %v379_v37, %v359_v35 }
  0x5e   : > { %381 = vst [vmem:[#allocation2] sm:$0x3] %v380_v38 }
  0x65   : > { %v388_v39 = vld [vmem:[#allocation2] sm:$0x3] }
  0x66   : > { %v390_v40 = vsel %vm389_vm7, %v388_v39, 0.0 }
  0x67   : > { %391 = vadd.xlane.f32.xlu0 %v390_v40 }
  0x6f   : > { %404 = vadd.xlane.f32.xlu0 %v403_v42 }
  0xda   : > { %v392_v43 = vpop.xlane.xlu0 %391 }
  0xdb   : > { %v393_v44 = vrot.slane %v392_v43, 4 }
  0xdd   : > { %v394_v45 = vadd.f32 %v393_v44, %v392_v43 }
  0xdf   : > { %v395_v46 = vrot.slane %v394_v45, 2 }
  0xe1   : > { %v396_v47 = vadd.f32 %v395_v46, %v394_v45 }
  0xe2   : > { %v405_v48 = vpop.xlane.xlu0 %404 }
  0xe3   : > { %v406_v49 = vrot.slane %v405_v48, 4  ;;  %v397_v50 = vrot.slane %v396_v47, 1 }
  0xe5   : > { %v407_v51 = vadd.f32 %v406_v49, %v405_v48  ;;  %v398_v52 = vadd.f32 %v397_v50, %v396_v47 }
  0xe7   : > { %v408_v53 = vrot.slane %v407_v51, 2  ;;  %618 = vpush %v398_v52 }
  0xe9   : > { %v409_v54 = vadd.f32 %v408_v53, %v407_v51 }
  0xeb   : > { %v410_v55 = vrot.slane %v409_v54, 1 }
  0xed   : > { %v411_v56 = vadd.f32 %v410_v55, %v409_v54 }
  0xef   : > { %620 = vpush %v411_v56 }
 0x118   : > { %s619_s29 = spop %618 }
 0x119   : > { %v400_v57 = vstv %s619_s29 }
 0x11a   : > { %401 = vst [vmem:[%s311_s5] sm:$0x1] %v400_v57 }
 0x11b   : > { %833 = shalt.err (!%p830_p1)
}
 0x11c   : > { %630 = dma.vmem_to_hbm [thread:$0]  (%p1011_p8), %s432_s8, 16, %s434_s24, %s416_s14  }
 0x11d   : > { %s317_s18 = scalar_lea.vmem [#allocation11], %s1066_s10  ;;  %s447_s19 = sshll.u32 %s443_s12, 4  ;;  %s448_s19 = int_to_ptr.hbm [resolvable:$true] %s447_s19 }
 0x11e   : > { %s445_s2 = sshll.u32 %s317_s18, 4  ;;  %s420_s25 = scalar_lea.sflag [#allocation12], %s1066_s10  ;;  %s446_s2 = int_to_ptr.vmem [resolvable:$true] %s445_s2 }
 0x11f   : > { %s848_s27 = sshra.s32 %s448_s19, 4  ;;  %s854_s8 = scalar_lea.hbm %s1142_s4, 2  ;;  %s849_s27 = int_to_ptr.hbm [resolvable:$true] %s848_s27 }
 0x120   : > { %s621_s21 = spop %620  ;;  %s850_s5 = scalar_lea.hbm %s849_s27, 1 }
 0x121   : > { %v413_v58 = vstv %s621_s21  ;;  %p851_p2 = scmp.ne.s32.totalorder %s849_s27, %s850_s5  ;;  %p855_p10 = scmp.lt.s32.totalorder %s849_s27, %s1142_s4 }
 0x122   : > { %414 = vst [vmem:[%s317_s18] sm:$0x1] %v413_v58  ;;  %p856_p3 = scmp.lt.s32.totalorder %s854_s8, %s850_s5 }
 0x123   : > { %p852_p4 = pnand %p851_p2, %p1011_p8 }
 0x124   : > { %p857_p5 = por %p856_p3, %p855_p10 }
 0x125   : > { %p853_p6 = pneg %p852_p4 }
 0x127   : > { %p858_p7 = pnand %p857_p5, %p853_p6 }
 0x129   : > { %861 = shalt.err (!%p858_p7)
}
 0x12a   : > { %631 = dma.vmem_to_hbm [thread:$0]  (%p1011_p8), %s446_s2, 16, %s448_s19, %s420_s25  }
 0x12b PF: > { %s459_s12 = sand.u32 1, %s908_s15   ;;  %p646_p11 = pnand %p596_p13, %p1015_p9 }
 0x12c   : > { %s460_s14 = scalar_lea.sflag [#allocation6], %s459_s12 }
 0x12d   : > { %p647_p12 = pneg %p646_p11 }
 0x12f   : > { %899 = dma.done.wait (%p647_p12), %s460_s14, 16  }
 0x130   : > { %901 = vsyncadd (%p647_p12), %s460_s14, 4294967280  ;;  %s469_s22 = scalar_lea.sflag [#allocation12], %s459_s12 }
 0x131   : > { %903 = dma.done.wait (%p647_p12), %s469_s22, 16  }
 0x132   : > { %905 = vsyncadd (%p647_p12), %s469_s22, 4294967280  ;;  %s27_s20 = sadd.s32 1, %s928_s20   ;;  %s1160_s18 = sld [smem:[#allocation18_spill]] }
 0x133   : > { %p24_p0 = scmp.ge.s32.totalorder %s27_s20, 4   ;;  %s1161_s19 = sld [smem:[#allocation20_spill]] }
 0x134   : > { %s1162_s15 = smov %s912_s16  ;;  %s1163_s16 = smov %s916_s17 }
 0x135   : > { %s1164_s17 = smov %s1053_s6  ;;  %26 = sbr.rel (!%p24_p0) target bundleno = 13 (0xd), region = 125 }
 0x13a   :  { %474 = vsyncpa [#allocation5], 1 }
 0x13b   :  { %476 = vsyncpa [#allocation5 + $0x1], 1 }
 0x13c   :  { %477 = vsyncpa [#allocation8], 1 }
 0x13d   :  { %479 = vsyncpa [#allocation8 + $0x1], 1 }
 0x13e   :  { %480 = vsyncpa [#allocation6], 1 }
 0x13f   :  { %482 = vsyncpa [#allocation6 + $0x1], 1 }
 0x140   :  { %483 = vsyncpa [#allocation12], 1 }
 0x141   :  { %485 = vsyncpa [#allocation12 + $0x1], 1 }

</bundles_post_ra>
